<compile_context>
chip_gen: v6e
topology: v6e:2x2x1
jax: 0.10.0
libtpu: 0.0.40
codegen_flags: <defaults>
</compile_context>

<pallas_src>
import jax
import jax.numpy as jnp
from jax.experimental import pallas as pl
from jax.experimental.pallas import tpu as pltpu

EPS = 1e-12
EPS_SQ = EPS * EPS  # max(sqrt(s), eps) == sqrt(max(s, eps^2)) -> lets us use rsqrt


def netvlad_kernel(x_ref, w_ref, c_ref, o_ref):
    # x_ref: (D, S) channel-major; w_ref, c_ref: (K, D); o_ref: (K, D)
    x = x_ref[...]                                               # (D, S) f32

    # F.normalize(x, p=2, dim=channel): per spatial position, scale by rsqrt(sum_d x^2)
    ssq = jnp.sum(x * x, axis=0, keepdims=True)                  # (1, S)
    xn = x * jax.lax.rsqrt(jnp.maximum(ssq, EPS_SQ))             # (D, S)

    # 1x1 conv without bias: logits[k, s] = sum_d w[k, d] * xn[d, s]
    # Plain (K,D)@(D,S) MXU matmul -- no operand transposes.
    # (At production sizes on v6e/v7x, casting xn / a to bf16 with f32 accumulation
    #  is the main MXU lever; kept f32 here to preserve the 1e-5 tolerance.)
    logits = jax.lax.dot_general(
        w_ref[...], xn, (((1,), (0,)), ((), ())),
        preferred_element_type=jnp.float32)                      # (K, S)

    # softmax over clusters (K = sublane axis), lane-dense over S
    m = jnp.max(logits, axis=0, keepdims=True)                   # (1, S)
    e = jnp.exp(logits - m)                                      # (K, S)
    a = e * pl.reciprocal(jnp.sum(e, axis=0, keepdims=True))     # (K, S)

    # vlad[k, d] = sum_s a[k,s] * xn[d,s]  -  c[k,d] * sum_s a[k,s]
    # Aggregation is a trans-B MXU matmul: contract S of a with S of xn.
    agg = jax.lax.dot_general(
        a, xn, (((1,), (1,)), ((), ())),
        preferred_element_type=jnp.float32)                      # (K, D)
    mass = jnp.sum(a, axis=1, keepdims=True)                     # (K, 1) lane reduce
    vlad = agg - c_ref[...] * mass                               # (K, D)

    # intra-normalization (per cluster, over D = lane axis)
    ssq_k = jnp.sum(vlad * vlad, axis=1, keepdims=True)          # (K, 1)
    vlad = vlad * jax.lax.rsqrt(jnp.maximum(ssq_k, EPS_SQ))

    # global L2 normalization over the flattened (K*D,) descriptor of this batch element
    gssq = jnp.sum(vlad * vlad, keepdims=True)                   # (1, 1)
    vlad = vlad * jax.lax.rsqrt(jnp.maximum(gssq, EPS_SQ))

    o_ref[...] = vlad.astype(o_ref.dtype)


def netvlad_forward(x_nchw, conv_w, centroids):
    """x_nchw: (N, D, H, W); conv_w, centroids: (K, D). Returns (N, K*D)."""
    N, D, H, W = x_nchw.shape
    K = conv_w.shape[0]
    S = H * W
    # NCHW -> (N, D, S): trailing-dim reshape only, no HBM transpose of x.
    x_nds = x_nchw.reshape(N, D, S).astype(jnp.float32)

    vlad = pl.pallas_call(
        netvlad_kernel,
        out_shape=jax.ShapeDtypeStruct((N, K, D), jnp.float32),
        grid_spec=pltpu.PrefetchScalarGridSpec(
            num_scalar_prefetch=0,
            grid=(N,),
            in_specs=[
                pl.BlockSpec((pl.Squeezed(), D, S), lambda n: (n, 0, 0)),
                pl.BlockSpec((K, D), lambda n: (0, 0)),
                pl.BlockSpec((K, D), lambda n: (0, 0)),
            ],
            out_specs=pl.BlockSpec((pl.Squeezed(), K, D), lambda n: (n, 0, 0)),
        ),
        compiler_params=pltpu.CompilerParams(
            dimension_semantics=("parallel",)),
    )(x_nds, conv_w.astype(jnp.float32), centroids.astype(jnp.float32))

    return vlad.reshape(N, K * D)


def netvlad_ref(x_nchw, conv_w, centroids):
    """Pure-JAX reference mirroring the PyTorch forward exactly."""
    N, D, H, W = x_nchw.shape
    nrm = jnp.sqrt(jnp.sum(x_nchw ** 2, axis=1, keepdims=True))
    xn = x_nchw / jnp.maximum(nrm, EPS)
    xf = xn.reshape(N, D, H * W)
    logits = jnp.einsum('kd,nds->nks', conv_w, xf)
    a = jax.nn.softmax(logits, axis=1)
    vlad = jnp.einsum('nks,nds->nkd', a, xf) \
        - centroids[None] * jnp.sum(a, axis=-1)[..., None]
    vn = jnp.sqrt(jnp.sum(vlad ** 2, axis=2, keepdims=True))
    vlad = vlad / jnp.maximum(vn, EPS)
    vlad = vlad.reshape(N, -1)
    gn = jnp.sqrt(jnp.sum(vlad ** 2, axis=1, keepdims=True))
    return vlad / jnp.maximum(gn, EPS)


if __name__ == "__main__":
    # Small, TPU-friendly shapes consistent with the module (dim=D, num_clusters=K)
    N, D, H, W = 2, 128, 8, 8
    K = 16

    key = jax.random.PRNGKey(0)
    kx, kw, kc = jax.random.split(key, 3)

    x = jax.random.normal(kx, (N, D, H, W), dtype=jnp.float32)
    # conv weight (K, D, 1, 1) in PyTorch -> (K, D) here, deterministic init
    conv_w = jax.random.normal(kw, (K, D), dtype=jnp.float32) * (1.0 / (D ** 0.5))
    # centroids = torch.rand(K, D) -> uniform [0, 1)
    centroids = jax.random.uniform(kc, (K, D), dtype=jnp.float32)

    out = netvlad_forward(x, conv_w, centroids)
    out = jax.block_until_ready(out)

    ref = netvlad_ref(x, conv_w, centroids)
    assert out.shape == (N, K * D)
    assert jnp.allclose(out, ref, atol=1e-5, rtol=1e-5), "mismatch vs reference"

    print("KERNEL_OK")
</pallas_src>

<mosaic_0001>
module attributes {stable_mosaic.version = 11 : i64} {
  func.func @netvlad_kernel(%arg0: i32, %arg1: memref<1x128x64xf32, #tpu.memory_space<vmem>>, %arg2: memref<16x128xf32, #tpu.memory_space<vmem>>, %arg3: memref<16x128xf32, #tpu.memory_space<vmem>>, %arg4: memref<1x16x128xf32, #tpu.memory_space<vmem>>) attributes {dimension_semantics = [#tpu.dimension_semantics<parallel>], iteration_bounds = array<i64: 2>, scalar_prefetch = 0 : i64, scratch_operands = 0 : i64, tpu.core_type = #tpu.core_type<tc>, window_params = [{transform_indices = @transform_0, window_bounds = array<i64: 1, 128, 64>}, {pipeline_mode = #tpu.pipeline_mode<synchronous>, transform_indices = @transform_1, window_bounds = array<i64: 16, 128>}, {pipeline_mode = #tpu.pipeline_mode<synchronous>, transform_indices = @transform_2, window_bounds = array<i64: 16, 128>}, {transform_indices = @transform_3, window_bounds = array<i64: 1, 16, 128>}]} {
    %c0 = arith.constant 0 : index
    %c0_0 = arith.constant 0 : index
    %c0_1 = arith.constant 0 : index
    %0 = vector.load %arg1[%c0, %c0_0, %c0_1] : memref<1x128x64xf32, #tpu.memory_space<vmem>>, vector<1x128x64xf32>
    %1 = vector.shape_cast %0 : vector<1x128x64xf32> to vector<128x64xf32>
    %2 = arith.mulf %1, %1 : vector<128x64xf32>
    %cst = arith.constant dense<0.000000e+00> : vector<64xf32>
    %3 = vector.multi_reduction <add>, %2, %cst [0] : vector<128x64xf32> to vector<64xf32>
    %4 = vector.shape_cast %3 : vector<64xf32> to vector<1x64xf32>
    %cst_2 = arith.constant 1.000000e-24 : f32
    %5 = vector.broadcast %cst_2 : f32 to vector<1x64xf32>
    %6 = arith.maximumf %4, %5 : vector<1x64xf32>
    %7 = math.rsqrt %6 : vector<1x64xf32>
    %8 = vector.broadcast %7 : vector<1x64xf32> to vector<128x64xf32>
    %9 = arith.mulf %1, %8 : vector<128x64xf32>
    %c0_3 = arith.constant 0 : index
    %c0_4 = arith.constant 0 : index
    %10 = vector.load %arg2[%c0_3, %c0_4] : memref<16x128xf32, #tpu.memory_space<vmem>>, vector<16x128xf32>
    %cst_5 = arith.constant dense<0.000000e+00> : vector<16x64xf32>
    %11 = tpu.matmul %10, %9, %cst_5 {dimension_numbers = #tpu.dot_dimension_numbers<[1], [0], [0], [1], [0, 0, 1, 1], [], []>} : vector<16x128xf32>, vector<128x64xf32>, vector<16x64xf32> -> vector<16x64xf32>
    %cst_6 = arith.constant dense<0xFF800000> : vector<64xf32>
    %12 = vector.multi_reduction <maximumf>, %11, %cst_6 [0] : vector<16x64xf32> to vector<64xf32>
    %13 = vector.shape_cast %12 : vector<64xf32> to vector<1x64xf32>
    %14 = vector.broadcast %13 : vector<1x64xf32> to vector<16x64xf32>
    %15 = arith.subf %11, %14 : vector<16x64xf32>
    %16 = math.exp %15 : vector<16x64xf32>
    %cst_7 = arith.constant dense<0.000000e+00> : vector<64xf32>
    %17 = vector.multi_reduction <add>, %16, %cst_7 [0] : vector<16x64xf32> to vector<64xf32>
    %18 = vector.shape_cast %17 : vector<64xf32> to vector<1x64xf32>
    %19 = tpu.reciprocal %18 : vector<1x64xf32> -> vector<1x64xf32>
    %20 = vector.broadcast %19 : vector<1x64xf32> to vector<16x64xf32>
    %21 = arith.mulf %16, %20 : vector<16x64xf32>
    %cst_8 = arith.constant dense<0.000000e+00> : vector<16x128xf32>
    %22 = tpu.matmul %21, %9, %cst_8 {dimension_numbers = #tpu.dot_dimension_numbers<[1], [1], [0], [0], [0, 0, 1, 0], [], []>} : vector<16x64xf32>, vector<128x64xf32>, vector<16x128xf32> -> vector<16x128xf32>
    %cst_9 = arith.constant dense<0.000000e+00> : vector<16xf32>
    %23 = vector.multi_reduction <add>, %21, %cst_9 [1] : vector<16x64xf32> to vector<16xf32>
    %24 = vector.shape_cast %23 : vector<16xf32> to vector<16x1xf32>
    %c0_10 = arith.constant 0 : index
    %c0_11 = arith.constant 0 : index
    %25 = vector.load %arg3[%c0_10, %c0_11] : memref<16x128xf32, #tpu.memory_space<vmem>>, vector<16x128xf32>
    %26 = vector.broadcast %24 : vector<16x1xf32> to vector<16x128xf32>
    %27 = arith.mulf %25, %26 : vector<16x128xf32>
    %28 = arith.subf %22, %27 : vector<16x128xf32>
    %29 = arith.mulf %28, %28 : vector<16x128xf32>
    %cst_12 = arith.constant dense<0.000000e+00> : vector<16xf32>
    %30 = vector.multi_reduction <add>, %29, %cst_12 [1] : vector<16x128xf32> to vector<16xf32>
    %31 = vector.shape_cast %30 : vector<16xf32> to vector<16x1xf32>
    %cst_13 = arith.constant 1.000000e-24 : f32
    %32 = vector.broadcast %cst_13 : f32 to vector<16x1xf32>
    %33 = arith.maximumf %31, %32 : vector<16x1xf32>
    %34 = math.rsqrt %33 : vector<16x1xf32>
    %35 = vector.broadcast %34 : vector<16x1xf32> to vector<16x128xf32>
    %36 = arith.mulf %28, %35 : vector<16x128xf32>
    %37 = arith.mulf %36, %36 : vector<16x128xf32>
    %38 = vector.shape_cast %37 : vector<16x128xf32> to vector<1x16x128xf32>
    %cst_14 = arith.constant dense<0.000000e+00> : vector<1xf32>
    %39 = vector.multi_reduction <add>, %38, %cst_14 [1, 2] : vector<1x16x128xf32> to vector<1xf32>
    %40 = vector.shape_cast %39 : vector<1xf32> to vector<1x1x1xf32>
    %41 = vector.extract %40[0, 0, 0] : f32 from vector<1x1x1xf32>
    %42 = vector.broadcast %41 : f32 to vector<1x1xf32>
    %cst_15 = arith.constant 1.000000e-24 : f32
    %43 = vector.broadcast %cst_15 : f32 to vector<1x1xf32>
    %44 = arith.maximumf %42, %43 : vector<1x1xf32>
    %45 = math.rsqrt %44 : vector<1x1xf32>
    %46 = vector.broadcast %45 : vector<1x1xf32> to vector<16x128xf32>
    %47 = arith.mulf %36, %46 : vector<16x128xf32>
    %c0_16 = arith.constant 0 : index
    %c0_17 = arith.constant 0 : index
    %c0_18 = arith.constant 0 : index
    %48 = vector.load %arg4[%c0_16, %c0_17, %c0_18] : memref<1x16x128xf32, #tpu.memory_space<vmem>>, vector<1x16x128xf32>
    %49 = vector.shape_cast %48 : vector<1x16x128xf32> to vector<16x128xf32>
    %50 = vector.shape_cast %47 : vector<16x128xf32> to vector<1x16x128xf32>
    tpu.vector_store %arg4[%c0_16, %c0_17, %c0_18], %50 {strides = array<i32>} : memref<1x16x128xf32, #tpu.memory_space<vmem>>, vector<1x16x128xf32>,
    return
  }
  func.func @transform_0(%arg0: i32) -> (i32, i32, i32) {
    %c0_i32 = arith.constant 0 : i32
    %c0_i32_0 = arith.constant 0 : i32
    %c0_i32_1 = arith.constant 0 : i32
    return %arg0, %c0_i32, %c0_i32_0 : i32, i32, i32
  }
  func.func @transform_1(%arg0: i32) -> (i32, i32) {
    %c0_i32 = arith.constant 0 : i32
    %c0_i32_0 = arith.constant 0 : i32
    %c0_i32_1 = arith.constant 0 : i32
    return %c0_i32, %c0_i32_0 : i32, i32
  }
  func.func @transform_2(%arg0: i32) -> (i32, i32) {
    %c0_i32 = arith.constant 0 : i32
    %c0_i32_0 = arith.constant 0 : i32
    %c0_i32_1 = arith.constant 0 : i32
    return %c0_i32, %c0_i32_0 : i32, i32
  }
  func.func @transform_3(%arg0: i32) -> (i32, i32, i32) {
    %c0_i32 = arith.constant 0 : i32
    %c0_i32_0 = arith.constant 0 : i32
    %c0_i32_1 = arith.constant 0 : i32
    return %arg0, %c0_i32, %c0_i32_0 : i32, i32, i32
  }
}

</mosaic_0001>

<bundles_post_ra>
// kernel: tpu_custom_call.1
= control target key start
LH: loop header
LB: loop body
LE: loop exit
PB: predicated region body
PF: predicated region fallthrough
CT: control target
= control target key end

     0   :  { %8 = vsyncpa [#allocation3], 0  ;;  %s1127_s0 = inlined_call_operand.vmem [shape: f32[2,128,64], index: 0, kind: input, shape index: {}]   ;;  %s1128_s1 = inlined_call_operand.vmem [shape: f32[16,128], index: 1, kind: input, shape index: {}]   ;;  %s1129_s2 = inlined_call_operand.vmem [shape: f32[16,128], index: 2, kind: input, shape index: {}]   ;;  %s1130_s3 = inlined_call_operand.hbm [shape: f32[2,16,128], index: 3, kind: output, shape index: {}]  }
   0x1   :  { %10 = vsyncpa [#allocation3 + $0x1], 0  ;;  %s889_s12 = smov 0   ;;  %s891_s13 = smov 0  }
   0x2   :  { %s893_s14 = smov 0   ;;  %s895_s15 = smov 0  }
   0x3 LB: > { %s910_s16 = sadd.s32 4294967295, %s864_s15   ;;  %s609_s17 = sadd.s32 4294967294, %s864_s15   ;;  %s864_s15 = sphi %s895_s15, %s1136_s15   ;;  %s860_s14 = sphi %s893_s14, %s1135_s14   ;;  %s856_s13 = sphi %s891_s13, %s1134_s13   ;;  %s852_s12 = sphi %s889_s12, %s1133_s12  }
   0x4   : > { %s914_s18 = sadd.s32 1, %s864_s15   ;;  %s91_s19 = sadd.s32 1, %s860_s14 }
   0x5   : > { %s88_s20 = ssub.s32 %s864_s15, %s914_s18  ;;  %p101_p0 = scmp.ne.s32.totalorder %s860_s14, %s856_s13 }
   0x6   : > { %p89_p1 = scmp.eq.s32.totalorder %s88_s20, 0  ;;  %p102_p2 = scmp.eq.s32.totalorder %s910_s16, 1 }
   0x7   : > { %p107_p3 = scmp.ne.s32.totalorder %s856_s13, %s852_s12  ;;  %p108_p4 = scmp.eq.s32.totalorder %s609_s17, 1 }
   0x8   : > { %s925_s21 = scalar_select %p89_p1, %s860_s14, %s91_s19  }
   0x9   : > { %p927_p5 = por %p102_p2, %p101_p0  ;;  %p931_p6 = por %p108_p4, %p107_p3 }
   0xa   : > { %p612_p7 = scmp.ge.s32.totalorder %s864_s15, 1  ;;  %p140_p8 = scmp.lt.s32.totalorder %s864_s15, 3 }
   0xc   : > { %p141_p9 = pnand %p612_p7, %p140_p8 }
   0xd   : > { %p164_p10 = scmp.lt.s32.totalorder (!%p141_p9), %s910_s16, 1  ;;  %s161_s11 = sand.u32 (!%p141_p9), 1, %s856_s13  }
   0xe   : > { %144 = sbr.rel (%p141_p9) target bundleno = 976 (0x3d0), region = 32  ;;  %s613_s17 = sshll.u32 (!%p141_p9), %s161_s11, 4 }
   0xf   : > { %s640_s19 = sshll.u32 (!%p141_p9), %s910_s16, 8  ;;  %s163_s20 = scalar_lea.vmem (!%p141_p9), [#allocation2], %s613_s17 }
  0x10   : > { %s547_s24 = sshll.u32 (!%p141_p9), %s163_s20, 4  ;;  %s1087_s28 = scalar_lea.sflag (!%p141_p9), [#allocation3], %s161_s11  ;;  %s1085_s24 = int_to_ptr.vmem [resolvable:$true] %s547_s24 }
  0x11   : > { %s866_s29 = smov (!%p141_p9), [#allocation2]  }
  0x13   : > { %v257_v0 = vld [vmem:[%s1128_s1] sm:$0xff]  ;;  %s165_s26 = scalar_select %p164_p10, %s910_s16, 1  ;;  %vm201_vm0 = vcmask 523264  }
  0x14   : > { %709 = vmatprep.mubr.f32.mxu0 %v257_v0  ;;  %s804_s16 = scalar_lea.vmem %s1085_s24, 256 }
  0x15   : > { %s639_s27 = sshll.u32 %s165_s26, 7  ;;  %p805_p11 = scmp.ne.s32.totalorder %s1085_s24, %s804_s16 }
  0x16   : > { %s945_s30 = scalar_lea.vmem %s1127_s0, %s639_s27  ;;  %s1083_s27 = scalar_lea.hbm %s1130_s3, %s640_s19 }
  0x17   : > { %v948_v1 = vld [vmem:[%s945_s30] sm:$0xff]  ;;  %v951_v2 = vld [vmem:[%s945_s30 + $0x8] sm:$0xff]  ;;  %v954_v3 = vld [vmem:[%s945_s30 + $0x10] sm:$0xff]  ;;  %p806_p12 = pnand %p805_p11, %p927_p5 }
  0x18   : > { %v957_v4 = vld [vmem:[%s945_s30 + $0x18] sm:$0xff]  ;;  %v960_v5 = vld [vmem:[%s945_s30 + $0x20] sm:$0xff]  ;;  %v185_v6 = vmul.f32 %v948_v1, %v948_v1  ;;  %v186_v7 = vmul.f32 %v951_v2, %v951_v2  ;;  %v187_v8 = vmul.f32 %v954_v3, %v954_v3  ;;  %v971_v10 = vld [vmem:[%s945_s30 + $0x28] sm:$0xff] }
  0x19   : > { %v188_v9 = vmul.f32 %v957_v4, %v957_v4  ;;  %v189_v12 = vmul.f32 %v960_v5, %v960_v5  ;;  %v978_v14 = vld [vmem:[%s945_s30 + $0x30] sm:$0xff]  ;;  %v190_v16 = vmul.f32 %v971_v10, %v971_v10  ;;  %v985_v19 = vld [vmem:[%s945_s30 + $0x38] sm:$0xff]  ;;  %v991_v23 = vld [vmem:[%s945_s30 + $0x40] sm:$0xff]  ;;  %p807_p13 = pneg %p806_p12 }
  0x1a   : > { %v202_v11 = vsel %vm201_vm0, %v185_v6, 0.0  ;;  %v203_v13 = vsel %vm201_vm0, %v186_v7, 0.0  ;;  %v205_v17 = vsel %vm201_vm0, %v187_v8, 0.0  ;;  %v191_v21 = vmul.f32 %v978_v14, %v978_v14  ;;  %v997_v27 = vld [vmem:[%s945_s30 + $0x48] sm:$0xff]  ;;  %v179_v31 = vld [vmem:[%s945_s30 + $0x50] sm:$0xff]  ;;  %v180_v35 = vld [vmem:[%s945_s30 + $0x58] sm:$0xff] }
  0x1b   : > { %v204_v15 = vadd.f32 %v203_v13, %v202_v11  ;;  %v207_v18 = vsel %vm201_vm0, %v188_v9, 0.0  ;;  %v209_v22 = vsel %vm201_vm0, %v189_v12, 0.0  ;;  %v192_v25 = vmul.f32 %v985_v19, %v985_v19  ;;  %v181_v39 = vld [vmem:[%s945_s30 + $0x60] sm:$0xff]  ;;  %v182_v43 = vld [vmem:[%s945_s30 + $0x68] sm:$0xff]  ;;  %v183_v47 = vld [vmem:[%s945_s30 + $0x70] sm:$0xff] }
  0x1c   : > { %v211_v26 = vsel %vm201_vm0, %v190_v16, 0.0  ;;  %v193_v29 = vmul.f32 %v991_v23, %v991_v23  ;;  %v213_v30 = vsel %vm201_vm0, %v191_v21, 0.0  ;;  %v194_v33 = vmul.f32 %v997_v27, %v997_v27  ;;  %v184_v51 = vld [vmem:[%s945_s30 + $0x78] sm:$0xff]  ;;  %s808_s30 = sshll.u32 %s866_s29, 4  ;;  %s809_s30 = int_to_ptr.vmem [resolvable:$false] %s808_s30 }
  0x1d   : > { %v206_v20 = vadd.f32 %v205_v17, %v204_v15  ;;  %v215_v34 = vsel %vm201_vm0, %v192_v25, 0.0  ;;  %v195_v37 = vmul.f32 %v179_v31, %v179_v31  ;;  %v196_v41 = vmul.f32 %v180_v35, %v180_v35  ;;  %s810_s4 = scalar_lea.vmem %s809_s30, 512  ;;  %p811_p0 = scmp.lt.s32.totalorder %s1085_s24, %s809_s30 }
  0x1e   : > { %v217_v38 = vsel %vm201_vm0, %v193_v29, 0.0  ;;  %v219_v42 = vsel %vm201_vm0, %v194_v33, 0.0  ;;  %v197_v45 = vmul.f32 %v181_v39, %v181_v39  ;;  %v198_v49 = vmul.f32 %v182_v43, %v182_v43  ;;  %p812_p1 = scmp.lt.s32.totalorder %s810_s4, %s804_s16 }
  0x1f   : > { %v208_v24 = vadd.f32 %v207_v18, %v206_v20  ;;  %v221_v46 = vsel %vm201_vm0, %v195_v37, 0.0  ;;  %v223_v50 = vsel %vm201_vm0, %v196_v41, 0.0  ;;  %v199_v53 = vmul.f32 %v183_v47, %v183_v47 }
  0x20   : > { %v225_v54 = vsel %vm201_vm0, %v197_v45, 0.0  ;;  %v200_v56 = vmul.f32 %v184_v51, %v184_v51  ;;  %v227_v57 = vsel %vm201_vm0, %v198_v49, 0.0  ;;  %p813_p2 = por %p812_p1, %p811_p0 }
  0x21   : > { %v210_v28 = vadd.f32 %v209_v22, %v208_v24  ;;  %v229_v59 = vsel %vm201_vm0, %v199_v53, 0.0 }
  0x22   : > { %v231_v61 = vsel %vm201_vm0, %v200_v56, 0.0  ;;  %p814_p3 = pnand %p813_p2, %p807_p13 }
  0x23   : > { %v212_v32 = vadd.f32 %v211_v26, %v210_v28 }
  0x25   : > { %v214_v36 = vadd.f32 %v213_v30, %v212_v32 }
  0x27   : > { %v216_v40 = vadd.f32 %v215_v34, %v214_v36 }
  0x29   : > { %v218_v44 = vadd.f32 %v217_v38, %v216_v40 }
  0x2b   : > { %v220_v48 = vadd.f32 %v219_v42, %v218_v44 }
  0x2d   : > { %v222_v52 = vadd.f32 %v221_v46, %v220_v48 }
  0x2f   : > { %v224_v55 = vadd.f32 %v223_v50, %v222_v52 }
  0x31   : > { %v226_v58 = vadd.f32 %v225_v54, %v224_v55 }
  0x33   : > { %v228_v60 = vadd.f32 %v227_v57, %v226_v58  ;;  %v496_v57 = vld [vmem:[%s1129_s2] sm:$0xff]  ;;  %v497_v58 = vld [vmem:[%s1129_s2 + $0x8] sm:$0xff] }
  0x35   : > { %v230_v62 = vadd.f32 %v229_v59, %v228_v60 }
  0x37   : > { %v232_v63 = vadd.f32 %v231_v61, %v230_v62 }
  0x39   : > { %v233_v0 = vrot.slane %v232_v63, 4 }
  0x3b   : > { %v234_v6 = vadd.f32 %v233_v0, %v232_v63 }
  0x3d   : > { %v235_v7 = vrot.slane %v234_v6, 2 }
  0x3f   : > { %v236_v8 = vadd.f32 %v235_v7, %v234_v6 }
  0x41   : > { %v237_v9 = vrot.slane %v236_v8, 1 }
  0x43   : > { %v238_v11 = vadd.f32 %v237_v9, %v236_v8 }
  0x45   : > { %v239_v12 = vmax.f32 %v238_v11, 1e-24 }
  0x47   : > { %790 = vrsqrt.f32 %v239_v12 }
  0x54   : > { %v791_v13 = vpop.eup %790 }
  0x55   : > { %v256_v15 = vmul.f32 %v791_v13, %v184_v51  ;;  %v255_v16 = vmul.f32 %v791_v13, %v183_v47  ;;  %v254_v17 = vmul.f32 %v791_v13, %v182_v43  ;;  %v253_v18 = vmul.f32 %v791_v13, %v181_v39 }
  0x56   : > { %v252_v20 = vmul.f32 %v791_v13, %v180_v35  ;;  %v251_v21 = vmul.f32 %v791_v13, %v179_v31  ;;  %v250_v22 = vmul.f32 %v791_v13, %v997_v27  ;;  %v249_v24 = vmul.f32 %v791_v13, %v991_v23 }
  0x57   : > { %677 = vmatprep.subr.mxu0 %v256_v15  ;;  %712 = vmatprep.subr.msk.mxu1 %vm201_vm0, %v256_v15  ;;  %v248_v25 = vmul.f32 %v791_v13, %v985_v19  ;;  %v247_v26 = vmul.f32 %v791_v13, %v978_v14  ;;  %v246_v27 = vmul.f32 %v791_v13, %v971_v10 }
  0x58   : > { %678 = vmatpush3.msra.mxu0 %v256_v15  ;;  %713 = vmatpush3.xpose.msk.msra.mxu1 %vm201_vm0, %v256_v15  ;;  %v245_v23 = vmul.f32 %v791_v13, %v960_v5  ;;  %v244_v19 = vmul.f32 %v791_v13, %v957_v4  ;;  %v243_v14 = vmul.f32 %v791_v13, %v954_v3  ;;  %v258_v3 = vld [vmem:[%s1128_s1 + $0x8] sm:$0xff] }
  0x59   : > { %679 = vmatprep.subr.mxu0 %v255_v16  ;;  %714 = vmatprep.subr.msk.mxu1 %vm201_vm0, %v255_v16  ;;  %v242_v10 = vmul.f32 %v791_v13, %v951_v2  ;;  %v241_v5 = vmul.f32 %v791_v13, %v948_v1 }
  0x5a   : > { %680 = vmatpush3.msra.mxu0 %v255_v16 }
  0x5b   : > { %681 = vmatprep.subr.mxu0 %v254_v17 }
  0x5c   : > { %682 = vmatpush3.msra.mxu0 %v254_v17  ;;  %715 = vmatpush3.xpose.msk.msra.mxu1 %vm201_vm0, %v255_v16 }
  0x5d   : > { %683 = vmatprep.subr.mxu0 %v253_v18  ;;  %716 = vmatprep.subr.msk.mxu1 %vm201_vm0, %v254_v17 }
  0x5e   : > { %684 = vmatpush3.msra.mxu0 %v253_v18 }
  0x5f   : > { %685 = vmatprep.subr.mxu0 %v252_v20 }
  0x60   : > { %686 = vmatpush3.msra.mxu0 %v252_v20  ;;  %717 = vmatpush3.xpose.msk.msra.mxu1 %vm201_vm0, %v254_v17 }
  0x61   : > { %687 = vmatprep.subr.mxu0 %v251_v21  ;;  %718 = vmatprep.subr.msk.mxu1 %vm201_vm0, %v253_v18 }
  0x62   : > { %688 = vmatpush3.msra.mxu0 %v251_v21 }
  0x63   : > { %689 = vmatprep.subr.mxu0 %v250_v22 }
  0x64   : > { %690 = vmatpush3.msra.mxu0 %v250_v22  ;;  %719 = vmatpush3.xpose.msk.msra.mxu1 %vm201_vm0, %v253_v18 }
  0x65   : > { %691 = vmatprep.subr.mxu0 %v249_v24  ;;  %720 = vmatprep.subr.msk.mxu1 %vm201_vm0, %v252_v20 }
  0x66   : > { %692 = vmatpush3.msra.mxu0 %v249_v24 }
  0x67   : > { %693 = vmatprep.subr.mxu0 %v248_v25 }
  0x68   : > { %694 = vmatpush3.msra.mxu0 %v248_v25  ;;  %721 = vmatpush3.xpose.msk.msra.mxu1 %vm201_vm0, %v252_v20 }
  0x69   : > { %695 = vmatprep.subr.mxu0 %v247_v26  ;;  %722 = vmatprep.subr.msk.mxu1 %vm201_vm0, %v251_v21 }
  0x6a   : > { %696 = vmatpush3.msra.mxu0 %v247_v26 }
  0x6b   : > { %697 = vmatprep.subr.mxu0 %v246_v27 }
  0x6c   : > { %698 = vmatpush3.msra.mxu0 %v246_v27  ;;  %723 = vmatpush3.xpose.msk.msra.mxu1 %vm201_vm0, %v251_v21 }
  0x6d   : > { %699 = vmatprep.subr.mxu0 %v245_v23  ;;  %724 = vmatprep.subr.msk.mxu1 %vm201_vm0, %v250_v22 }
  0x6e   : > { %700 = vmatpush3.msra.mxu0 %v245_v23 }
  0x6f   : > { %701 = vmatprep.subr.mxu0 %v244_v19 }
  0x70   : > { %702 = vmatpush3.msra.mxu0 %v244_v19  ;;  %725 = vmatpush3.xpose.msk.msra.mxu1 %vm201_vm0, %v250_v22 }
  0x71   : > { %703 = vmatprep.subr.mxu0 %v243_v14  ;;  %726 = vmatprep.subr.msk.mxu1 %vm201_vm0, %v249_v24 }
  0x72   : > { %704 = vmatpush3.msra.mxu0 %v243_v14 }
  0x73   : > { %705 = vmatprep.subr.mxu0 %v242_v10 }
  0x74   : > { %706 = vmatpush3.msra.mxu0 %v242_v10  ;;  %727 = vmatpush3.xpose.msk.msra.mxu1 %vm201_vm0, %v249_v24 }
  0x75   : > { %707 = vmatprep.subr.mxu0 %v241_v5  ;;  %728 = vmatprep.subr.msk.mxu1 %vm201_vm0, %v248_v25 }
  0x76   : > { %708 = vmatpush3.msra.mxu0 %v241_v5 }
  0x77   : > { %710 = vmatmul.mubr.f32.vlgmr.msra.gmra.mxu0 %v258_v3 }
  0x78   : > { %729 = vmatpush3.xpose.msk.msra.mxu1 %vm201_vm0, %v248_v25 }
  0x79   : > { %730 = vmatprep.subr.msk.mxu1 %vm201_vm0, %v247_v26 }
  0x7c   : > { %731 = vmatpush3.xpose.msk.msra.mxu1 %vm201_vm0, %v247_v26 }
  0x7d   : > { %732 = vmatprep.subr.msk.mxu1 %vm201_vm0, %v246_v27 }
  0x80   : > { %733 = vmatpush3.xpose.msk.msra.mxu1 %vm201_vm0, %v246_v27 }
  0x81   : > { %734 = vmatprep.subr.msk.mxu1 %vm201_vm0, %v245_v23 }
  0x84   : > { %735 = vmatpush3.xpose.msk.msra.mxu1 %vm201_vm0, %v245_v23 }
  0x85   : > { %736 = vmatprep.subr.msk.mxu1 %vm201_vm0, %v244_v19 }
  0x88   : > { %737 = vmatpush3.xpose.msk.msra.mxu1 %vm201_vm0, %v244_v19 }
  0x89   : > { %738 = vmatprep.subr.msk.mxu1 %vm201_vm0, %v243_v14 }
  0x8c   : > { %739 = vmatpush3.xpose.msk.msra.mxu1 %vm201_vm0, %v243_v14 }
  0x8d   : > { %740 = vmatprep.subr.msk.mxu1 %vm201_vm0, %v242_v10 }
  0x90   : > { %741 = vmatpush3.xpose.msk.msra.mxu1 %vm201_vm0, %v242_v10 }
  0x91   : > { %742 = vmatprep.subr.msk.mxu1 %vm201_vm0, %v241_v5 }
  0x94   : > { %743 = vmatpush3.xpose.msk.msra.mxu1 %vm201_vm0, %v241_v5 }
 0x137   : > { %v711_v1 = vpop.f32.mrf.mxu0 }
 0x138   : > { %v335_v4 = vsel %vm201_vm0, %v711_v1, -inf }
 0x139   : > { %v325_v2 = vpop.f32.mrf.mxu0 }
 0x13a   : > { %v334_v28 = vsel %vm201_vm0, %v325_v2, -inf }
 0x13b   : > { %v336_v29 = vmax.f32 %v334_v28, %v335_v4 }
 0x13d   : > { %v337_v30 = vrot.slane %v336_v29, 4 }
 0x13f   : > { %v338_v31 = vmax.f32 %v336_v29, %v337_v30 }
 0x141   : > { %v339_v32 = vrot.slane %v338_v31, 2 }
 0x143   : > { %v340_v33 = vmax.f32 %v338_v31, %v339_v32 }
 0x145   : > { %v341_v34 = vrot.slane %v340_v33, 1 }
 0x147   : > { %v342_v35 = vmax.f32 %v340_v33, %v341_v34 }
 0x149   : > { %v343_v36 = vsub.f32 %v325_v2, %v342_v35  ;;  %v344_v37 = vsub.f32 %v711_v1, %v342_v35 }
 0x14b   : > { %v345_v38 = vmul.f32 1.442695, %v343_v36  ;;  %v347_v39 = vmul.f32 1.442695, %v344_v37 }
 0x14d   : > { %792 = vpow2.f32 %v345_v38 }
 0x14e   : > { %794 = vpow2.f32 %v347_v39 }
 0x15a   : > { %v793_v40 = vpop.eup %792 }
 0x15b   : > { %v795_v41 = vpop.eup %794  ;;  %v349_v42 = vsel %vm201_vm0, %v793_v40, 0.0 }
 0x15c   : > { %v350_v43 = vsel %vm201_vm0, %v795_v41, 0.0 }
 0x15d   : > { %v351_v44 = vadd.f32 %v350_v43, %v349_v42 }
 0x15f   : > { %v352_v45 = vrot.slane %v351_v44, 4 }
 0x161   : > { %v353_v46 = vadd.f32 %v352_v45, %v351_v44 }
 0x163   : > { %v354_v47 = vrot.slane %v353_v46, 2 }
 0x165   : > { %v355_v48 = vadd.f32 %v354_v47, %v353_v46 }
 0x167   : > { %v356_v49 = vrot.slane %v355_v48, 1 }
 0x169   : > { %v357_v50 = vadd.f32 %v356_v49, %v355_v48 }
 0x16b   : > { %796 = vrcp.f32 %v357_v50 }
 0x178   : > { %v797_v51 = vpop.eup %796 }
 0x179   : > { %v359_v52 = vmul.f32 %v797_v51, %v793_v40  ;;  %v360_v53 = vmul.f32 %v797_v51, %v795_v41 }
 0x17b   : > { %744 = vmatprep.mubr.msk.f32.mxu1 %vm201_vm0, %v359_v52  ;;  %v490_v54 = vsel %vm201_vm0, %v359_v52, 0.0  ;;  %v493_v55 = vsel %vm201_vm0, %v360_v53, 0.0 }
 0x17c   : > { %491 = vadd.xlane.f32.xlu0 %v490_v54  ;;  %745 = vmatmul.mubr.msk.f32.vlgmr.msra.gmra.mxu1 %vm201_vm0, %v360_v53 }
 0x180   : > { %494 = vadd.xlane.f32.xlu0 %v493_v55 }
 0x205   : > { %v492_v56 = vpop.xlane.xlu0 %491 }
 0x206   : > { %v498_v61 = vmul.f32 %v496_v57, %v492_v56 }
 0x209   : > { %v495_v59 = vpop.xlane.xlu0 %494 }
 0x20a   : > { %v499_v63 = vmul.f32 %v497_v58, %v495_v59 }
 0x23c   : > { %v746_v60 = vpop.f32.mrf.mxu1 }
 0x23d   : > { %v501_v6 = vsub.f32 %v746_v60, %v499_v63 }
 0x23e   : > { %v481_v62 = vpop.f32.mrf.mxu1 }
 0x23f   : > { %v500_v0 = vsub.f32 %v481_v62, %v498_v61  ;;  %v503_v8 = vmul.f32 %v501_v6, %v501_v6 }
 0x241   : > { %v502_v7 = vmul.f32 %v500_v0, %v500_v0 }
 0x243   : > { %504 = vadd.xlane.f32.xlu1 %v502_v7 }
 0x247   : > { %506 = vadd.xlane.f32.xlu1 %v503_v8 }
 0x2cc   : > { %v505_v9 = vpop.xlane.xlu1 %504 }
 0x2cd   : > { %v508_v11 = vmax.f32 %v505_v9, 1e-24 }
 0x2cf   : > { %798 = vrsqrt.f32 %v508_v11 }
 0x2d0   : > { %v507_v12 = vpop.xlane.xlu1 %506 }
 0x2d1   : > { %v509_v13 = vmax.f32 %v507_v12, 1e-24 }
 0x2d3   : > { %800 = vrsqrt.f32 %v509_v13 }
 0x2dc   : > { %v799_v15 = vpop.eup %798 }
 0x2dd   : > { %v512_v16 = vmul.f32 %v799_v15, %v500_v0 }
 0x2df   : > { %v514_v20 = vmul.f32 %v512_v16, %v512_v16 }
 0x2e0   : > { %v801_v17 = vpop.eup %800 }
 0x2e1   : > { %v513_v18 = vmul.f32 %v801_v17, %v501_v6 }
 0x2e3   : > { %v515_v21 = vmul.f32 %v513_v18, %v513_v18 }
 0x2e5   : > { %v516_v22 = vadd.f32 %v515_v21, %v514_v20 }
 0x2e7   : > { %517 = vadd.xlane.f32.xlu0 %v516_v22 }
 0x370   : > { %v518_v24 = vpop.xlane.xlu0 %517 }
 0x371   : > { %v519_v25 = vrot.slane %v518_v24, 4 }
 0x373   : > { %v520_v26 = vadd.f32 %v519_v25, %v518_v24 }
 0x375   : > { %v521_v27 = vrot.slane %v520_v26, 2 }
 0x377   : > { %v522_v23 = vadd.f32 %v521_v27, %v520_v26 }
 0x379   : > { %v523_v19 = vrot.slane %v522_v23, 1 }
 0x37b   : > { %v524_v14 = vadd.f32 %v523_v19, %v522_v23 }
 0x37d   : > { %747 = vpush %v524_v14 }
 0x3ae   : > { %s748_s10 = spop %747 }
 0x3af   : > { %v526_v10 = vstv %s748_s10 }
 0x3b0   : > { %v527_v5 = vmax.f32 %v526_v10, 1e-24 }
 0x3b2   : > { %802 = vrsqrt.f32 %v527_v5 }
 0x3bf   : > { %v803_v3 = vpop.eup %802 }
 0x3c0   : > { %v529_v1 = vmul.f32 %v803_v3, %v512_v16  ;;  %v530_v2 = vmul.f32 %v803_v3, %v513_v18 }
 0x3c2   : > { %531 = vst [vmem:[%s163_s20] sm:$0xff] %v529_v1  ;;  %532 = vst [vmem:[%s163_s20 + $0x8] sm:$0xff] %v530_v2 }
 0x3c3   : > { %817 = shalt.err (!%p814_p3)
}
 0x3c4   : > { %s818_s5 = scalar_lea.hbm %s1083_s27, 256  ;;  %s822_s8 = scalar_lea.hbm %s1130_s3, 512 }
 0x3c5   : > { %p819_p4 = scmp.ne.s32.totalorder %s1083_s27, %s818_s5  ;;  %p823_p9 = scmp.lt.s32.totalorder %s1083_s27, %s1130_s3 }
 0x3c6   : > { %p824_p10 = scmp.lt.s32.totalorder %s822_s8, %s818_s5 }
 0x3c7   : > { %p820_p7 = pnand %p819_p4, %p927_p5 }
 0x3c8   : > { %p825_p11 = por %p824_p10, %p823_p9 }
 0x3c9   : > { %p821_p8 = pneg %p820_p7 }
 0x3cb   : > { %p826_p12 = pnand %p825_p11, %p821_p8 }
 0x3cd   : > { %829 = shalt.err (!%p826_p12)
}
 0x3ce   : > { %s867_s11 = smov 128   ;;  %s868_s17 = smov 8  }
 0x3cf   : > { %749 = dma.vmem_to_hbm [thread:$0]  (%p927_p5), %s1085_s24, 256, %s1083_s27, %s1087_s28, %s867_s11, %s867_s11, %s868_s17  }
 0x3d0 PF: > { %p755_p13 = scmp.ge.s32.totalorder %s864_s15, 2  ;;  %s562_s19 = sand.u32 1, %s852_s12  }
 0x3d1   : > { %s563_s20 = scalar_lea.sflag [#allocation3], %s562_s19 }
 0x3d2   : > { %p752_p0 = pnand %p755_p13, %p931_p6 }
 0x3d4   : > { %p753_p1 = pneg %p752_p0 }
 0x3d6   : > { %847 = dma.done.wait (%p753_p1), %s563_s20, 256  }
 0x3d7   : > { %849 = vsyncadd (%p753_p1), %s563_s20, 4294967040  ;;  %p13_p2 = scmp.ge.s32.totalorder %s914_s18, 4   ;;  %s1133_s12 = smov %s856_s13 }
 0x3d8   : > { %s1134_s13 = smov %s860_s14  ;;  %s1135_s14 = smov %s925_s21 }
 0x3d9   : > { %s1136_s15 = smov %s914_s18  ;;  %15 = sbr.rel (!%p13_p2) target bundleno = 3 (0x3), region = 67 }
 0x3de   :  { %568 = vsyncpa [#allocation3], 1 }
 0x3df   :  { %570 = vsyncpa [#allocation3 + $0x1], 1 }

</bundles_post_ra>
